<compile_context>
chip_gen: v6e
topology: v6e:2x2x1
jax: 0.10.0
libtpu: 0.0.40
codegen_flags: <defaults>
</compile_context>

<pallas_src>
import functools
import math

import jax
import jax.numpy as jnp
from jax import lax
from jax.experimental import pallas as pl
from jax.experimental.pallas import tpu as pltpu


def _myloss_tile_kernel(xn_ref, yn_ref, dcol_ref, drow_ref, vcol_ref, vrow_ref,
                        hinge_ref, rank_ref, *, delta, folds, has_pad):
    """One (t, t) tile of the similarity / hinge-loss / rank-count work.

    xn_ref:    (t, D) bf16  normalized x rows of row block i (resident over j)
    yn_ref:    (t, D) bf16  normalized y rows of col block j (streamed over j)
    dcol_ref:  (t, 1) f32   diag[r] for this tile's rows
    drow_ref:  (1, t) f32   diag[c] for this tile's columns
    vcol_ref:  (t, 1) f32   1.0 for real rows, 0.0 for padding
    vrow_ref:  (1, t) f32   1.0 for real cols, 0.0 for padding
    hinge_ref: (t, 128) f32 per-row hinge partial sums (accumulated over j)
    rank_ref:  (t, 128) f32 per-row counts of (score > 0)  (accumulated over j)
    """
    i = pl.program_id(0)
    j = pl.program_id(1)

    @pl.when(j == 0)
    def _init():
        hinge_ref[...] = jnp.zeros_like(hinge_ref)
        rank_ref[...] = jnp.zeros_like(rank_ref)

    # bf16 MXU matmul with f32 accumulation, contracting the last dim of BOTH
    # operands (y is never transposed / relayouted).
    sim = lax.dot_general(
        xn_ref[...], yn_ref[...],
        dimension_numbers=(((1,), (1,)), ((), ())),
        preferred_element_type=jnp.float32,
    )                                                     # (t, t) f32

    dcol = dcol_ref[...]                                  # (t, 1)
    drow = drow_ref[...]                                  # (1, t)

    # score[r, c] = sim[r, c] - diag[r]   (== similarity_m - cor_similarity)
    score = sim - dcol
    t1 = jnp.maximum(score + delta, 0.0)                  # relu(sim - diag[r] + d)
    t2 = jnp.maximum(sim - drow + delta, 0.0)             # relu(sim - diag[c] + d)
    contrib = t1 + t2
    gt = jnp.where(score > 0.0, 1.0, 0.0)                 # rank indicator

    if has_pad:
        valid = vcol_ref[...] * vrow_ref[...]              # (t, t) 0/1 mask
        contrib = contrib * valid
        gt = gt * vrow_ref[...]                            # padded cols never count

    def _fold(tile):
        # Fold (t, t) -> (t, 128) with lane-aligned VPU adds (no XLU reduce,
        # no narrow masked stores on the hot path).
        acc = tile[:, 0:128]
        for c in range(1, folds):
            acc = acc + tile[:, c * 128:(c + 1) * 128]
        return acc

    @pl.when(i != j)
    def _offdiag():
        hinge_ref[...] += _fold(contrib)
        rank_ref[...] += _fold(gt)

    @pl.when(i == j)
    def _diag():
        # Diagonal tile: exclude r == c exactly from both the hinge sum and
        # the rank count (robust to bf16 perturbation of score[r, r]).
        t = contrib.shape[0]
        r_ids = lax.broadcasted_iota(jnp.int32, (t, t), 0)
        c_ids = lax.broadcasted_iota(jnp.int32, (t, t), 1)
        nd = jnp.where(r_ids != c_ids, 1.0, 0.0)
        hinge_ref[...] += _fold(contrib * nd)
        rank_ref[...] += _fold(gt * nd)


def _pick_block(n_pad, requested=None):
    """Largest tile in (512, 256, 128) dividing padded N, preferring >= 2 row
    blocks so both v7x TensorCores get work on the 'parallel' axis."""
    if requested is not None:
        assert requested % 128 == 0 and n_pad % requested == 0
        return requested
    for t in (512, 256, 128):
        if n_pad % t == 0 and (n_pad // t >= 2 or t == 128):
            return t
    return 128


def myloss_forward(x, y, delta, block=None):
    """Mirrors myloss(delta).forward(x, y) -> (loss, recall[1,5,10], ndcg[1,5,10])."""
    n, d = x.shape
    delta = float(delta)

    x = x.astype(jnp.float32)
    y = y.astype(jnp.float32)

    # Row-wise L2 normalization, hoisted out of the kernel (computed exactly
    # once).  No epsilon, matching the torch reference (0-norm rows -> NaN).
    x_n = x * lax.rsqrt(jnp.sum(x * x, axis=1, keepdims=True))
    y_n = y * lax.rsqrt(jnp.sum(y * y, axis=1, keepdims=True))
    diag = jnp.sum(x_n * y_n, axis=1, keepdims=True)       # (n, 1) f32

    # Pad N up to a multiple of 128: keeps every tile lane-dense for any N.
    n_pad = ((n + 127) // 128) * 128
    pad = n_pad - n
    has_pad = pad > 0

    xb = x_n.astype(jnp.bfloat16)                          # bf16 dot operands
    yb = y_n.astype(jnp.bfloat16)
    dcol = diag
    if has_pad:
        xb = jnp.pad(xb, ((0, pad), (0, 0)))
        yb = jnp.pad(yb, ((0, pad), (0, 0)))
        dcol = jnp.pad(dcol, ((0, pad), (0, 0)))
    drow = dcol.reshape(1, n_pad)
    valid = (jnp.arange(n_pad) < n).astype(jnp.float32)
    vcol = valid.reshape(n_pad, 1)
    vrow = valid.reshape(1, n_pad)

    t = _pick_block(n_pad, block)
    g = n_pad // t
    folds = t // 128

    kernel = functools.partial(_myloss_tile_kernel, delta=delta, folds=folds,
                               has_pad=has_pad)

    hinge_p, rank_p = pl.pallas_call(
        kernel,
        grid=(g, g),                                       # (row blocks, col blocks)
        in_specs=[
            pl.BlockSpec((t, d), lambda i, j: (i, 0)),     # x_n rows (resident over j)
            pl.BlockSpec((t, d), lambda i, j: (j, 0)),     # y_n rows (streamed over j)
            pl.BlockSpec((t, 1), lambda i, j: (i, 0)),     # diag, sublane-oriented
            pl.BlockSpec((1, t), lambda i, j: (0, j)),     # diag, lane-oriented
            pl.BlockSpec((t, 1), lambda i, j: (i, 0)),     # row validity
            pl.BlockSpec((1, t), lambda i, j: (0, j)),     # col validity
        ],
        out_specs=(
            pl.BlockSpec((t, 128), lambda i, j: (i, 0)),   # hinge partials (resident)
            pl.BlockSpec((t, 128), lambda i, j: (i, 0)),   # rank partials  (resident)
        ),
        out_shape=(
            jax.ShapeDtypeStruct((n_pad, 128), jnp.float32),
            jax.ShapeDtypeStruct((n_pad, 128), jnp.float32),
        ),
        compiler_params=pltpu.CompilerParams(
            # i is independent (megacore-shardable on v7x); j is the reduction
            # axis of the resident accumulators -> must stay "arbitrary".
            dimension_semantics=("parallel", "arbitrary"),
        ),
    )(xb, yb, dcol, drow, vcol, vrow)

    # Diagonal terms were masked out exactly in-kernel; just reduce and scale.
    loss = jnp.sum(hinge_p[:n]) / n

    # rank[r] = #{c != r : score[r, c] > 0} == position of the diagonal in the
    # descending sort (score[r, r] == 0 in exact arithmetic).
    rank = jnp.sum(rank_p[:n], axis=1)                     # (n,) f32 counts

    recall = [jnp.sum(rank < k).astype(jnp.int32) for k in (1, 5, 10)]
    dcg_w = jnp.log(2.0) / jnp.log(2.0 + rank)             # log(2)/log(2+pos)
    ndcg = [jnp.sum(jnp.where(rank < k, dcg_w, 0.0)) for k in (1, 5, 10)]

    return loss, recall, ndcg


# ----------------------------------------------------------------------------
# References for the self-test
# ----------------------------------------------------------------------------
def _myloss_reference(x, y, delta):
    """Pure-JAX transliteration of the torch module (f32 + top_k)."""
    x = x.astype(jnp.float32)
    y = y.astype(jnp.float32)
    x_n = x / jnp.sqrt(jnp.sum(x * x, axis=1, keepdims=True))
    y_n = y / jnp.sqrt(jnp.sum(y * y, axis=1, keepdims=True))
    sim = jnp.dot(x_n, y_n.T, precision=lax.Precision.HIGHEST)
    n = x.shape[0]
    cor = jnp.diag(sim)[:, None]
    l = jnp.maximum(0.0, sim - cor + delta) + jnp.maximum(0.0, sim.T - cor + delta)
    l = l * (1.0 - jnp.eye(n, dtype=jnp.float32))
    loss = jnp.sum(l) / n

    score = sim - cor
    _, pred = lax.top_k(score, 10)
    pred = pred.T                                          # (10, n)
    target = jnp.arange(n)[None, :]
    correct = pred == target
    recall = [int(jnp.sum(correct[:k])) for k in (1, 5, 10)]
    w = (jnp.log(2.0) / jnp.log(2.0 + jnp.arange(10, dtype=jnp.float32)))[:, None]
    weighted = correct.astype(jnp.float32) * w
    ndcg = [float(jnp.sum(weighted[:k])) for k in (1, 5, 10)]
    return loss, recall, ndcg


def _rank_reference_bf16(x, y):
    """Metric reference with the kernel's numerics (bf16 dot, rank = count>0)."""
    x = x.astype(jnp.float32)
    y = y.astype(jnp.float32)
    x_n = x * lax.rsqrt(jnp.sum(x * x, axis=1, keepdims=True))
    y_n = y * lax.rsqrt(jnp.sum(y * y, axis=1, keepdims=True))
    diag = jnp.sum(x_n * y_n, axis=1, keepdims=True)
    sim = jnp.dot(x_n.astype(jnp.bfloat16), y_n.astype(jnp.bfloat16).T,
                  preferred_element_type=jnp.float32)
    score = sim - diag
    n = x.shape[0]
    offdiag = ~jnp.eye(n, dtype=bool)
    rank = jnp.sum(((score > 0.0) & offdiag).astype(jnp.float32), axis=1)
    recall = [int(jnp.sum(rank < k)) for k in (1, 5, 10)]
    w = jnp.log(2.0) / jnp.log(2.0 + rank)
    ndcg = [float(jnp.sum(jnp.where(rank < k, w, 0.0))) for k in (1, 5, 10)]
    return recall, ndcg


def _check_case(x, y, delta, check_topk_metrics):
    loss, recall, ndcg = myloss_forward(x, y, delta)
    jax.block_until_ready(loss)
    recall = [int(r) for r in recall]
    ndcg = [float(v) for v in ndcg]

    ref_loss, ref_recall, ref_ndcg = _myloss_reference(x, y, delta)
    assert jnp.allclose(loss, ref_loss, rtol=1e-2, atol=1e-2), (loss, ref_loss)

    if check_topk_metrics:
        # Well-separated scores -> exact agreement with the torch semantics.
        assert recall == ref_recall, (recall, ref_recall)
        assert all(abs(a - b) < 1e-3 for a, b in zip(ndcg, ref_ndcg)), (ndcg, ref_ndcg)
    else:
        # Random data: validate against a reference with matched bf16 numerics
        # (ordering near the score==0 threshold is bf16-sensitive by nature).
        mrecall, mndcg = _rank_reference_bf16(x, y)
        assert all(abs(a - b) <= 1 for a, b in zip(recall, mrecall)), (recall, mrecall)
        assert all(abs(a - b) <= 0.1 for a, b in zip(ndcg, mndcg)), (ndcg, mndcg)


if __name__ == "__main__":
    key = jax.random.PRNGKey(0)
    k1, k2, k3, k4, k5, k6 = jax.random.split(key, 6)

    # Case 1: small N (24 -> padded to 128, single block, padded + diag path).
    # Correlated x/y keeps every score far from the top-k decision threshold,
    # so the metrics must match the torch-semantics f32 reference exactly.
    x1 = jax.random.normal(k1, (24, 128), jnp.float32)
    y1 = x1 + 0.3 * jax.random.normal(k2, (24, 128), jnp.float32)
    _check_case(x1, y1, delta=1.0, check_topk_metrics=True)

    # Case 2: N=256 (no padding), 2x2 grid of 128x128 tiles, random data.
    x2 = jax.random.normal(k3, (256, 128), jnp.float32)
    y2 = jax.random.normal(k4, (256, 128), jnp.float32)
    _check_case(x2, y2, delta=0.2, check_topk_metrics=False)

    # Case 3: N=200 (padded to 256), multi-block grid with padded last blocks.
    x3 = jax.random.normal(k5, (200, 128), jnp.float32)
    y3 = jax.random.normal(k6, (200, 128), jnp.float32)
    _check_case(x3, y3, delta=0.2, check_topk_metrics=False)

    print("KERNEL_OK")
</pallas_src>

<mosaic_0001>
module attributes {stable_mosaic.version = 11 : i64} {
  func.func @_myloss_tile_kernel(%arg0: i32, %arg1: i32, %arg2: memref<128x128xbf16, #tpu.memory_space<vmem>>, %arg3: memref<128x128xbf16, #tpu.memory_space<vmem>>, %arg4: memref<128x1xf32, #tpu.memory_space<vmem>>, %arg5: memref<1x128xf32, #tpu.memory_space<vmem>>, %arg6: memref<128x1xf32, #tpu.memory_space<vmem>>, %arg7: memref<1x128xf32, #tpu.memory_space<vmem>>, %arg8: memref<128x128xf32, #tpu.memory_space<vmem>>, %arg9: memref<128x128xf32, #tpu.memory_space<vmem>>) attributes {dimension_semantics = [#tpu.dimension_semantics<parallel>, #tpu.dimension_semantics<arbitrary>], iteration_bounds = array<i64: 1, 1>, scalar_prefetch = 0 : i64, scratch_operands = 0 : i64, tpu.core_type = #tpu.core_type<tc>, window_params = [{transform_indices = @transform_0, window_bounds = array<i64: 128, 128>}, {transform_indices = @transform_1, window_bounds = array<i64: 128, 128>}, {transform_indices = @transform_2, window_bounds = array<i64: 128, 1>}, {transform_indices = @transform_3, window_bounds = array<i64: 1, 128>}, {transform_indices = @transform_4, window_bounds = array<i64: 128, 1>}, {transform_indices = @transform_5, window_bounds = array<i64: 1, 128>}, {transform_indices = @transform_6, window_bounds = array<i64: 128, 128>}, {transform_indices = @transform_7, window_bounds = array<i64: 128, 128>}]} {
    %c0_i32 = arith.constant 0 : i32
    %0 = arith.cmpi eq, %arg1, %c0_i32 : i32
    %1 = arith.extui %0 : i1 to i32
    %c0_i32_0 = arith.constant 0 : i32
    %2 = arith.cmpi ne, %1, %c0_i32_0 : i32
    scf.if %2 {
      %cst_23 = arith.constant 0.000000e+00 : f32
      %41 = vector.broadcast %cst_23 : f32 to vector<128x128xf32>
      %c0_24 = arith.constant 0 : index
      %c0_25 = arith.constant 0 : index
      %42 = vector.load %arg8[%c0_24, %c0_25] : memref<128x128xf32, #tpu.memory_space<vmem>>, vector<128x128xf32>
      tpu.vector_store %arg8[%c0_24, %c0_25], %41 {strides = array<i32>} : memref<128x128xf32, #tpu.memory_space<vmem>>, vector<128x128xf32>,
      %cst_26 = arith.constant 0.000000e+00 : f32
      %43 = vector.broadcast %cst_26 : f32 to vector<128x128xf32>
      %c0_27 = arith.constant 0 : index
      %c0_28 = arith.constant 0 : index
      %44 = vector.load %arg9[%c0_27, %c0_28] : memref<128x128xf32, #tpu.memory_space<vmem>>, vector<128x128xf32>
      tpu.vector_store %arg9[%c0_27, %c0_28], %43 {strides = array<i32>} : memref<128x128xf32, #tpu.memory_space<vmem>>, vector<128x128xf32>,
    } else {
    }
    %c0 = arith.constant 0 : index
    %c0_1 = arith.constant 0 : index
    %3 = vector.load %arg2[%c0, %c0_1] : memref<128x128xbf16, #tpu.memory_space<vmem>>, vector<128x128xbf16>
    %c0_2 = arith.constant 0 : index
    %c0_3 = arith.constant 0 : index
    %4 = vector.load %arg3[%c0_2, %c0_3] : memref<128x128xbf16, #tpu.memory_space<vmem>>, vector<128x128xbf16>
    %cst = arith.constant dense<0.000000e+00> : vector<128x128xf32>
    %5 = tpu.matmul %3, %4, %cst {dimension_numbers = #tpu.dot_dimension_numbers<[1], [1], [0], [0], [0, 0, 1, 0], [], []>} : vector<128x128xbf16>, vector<128x128xbf16>, vector<128x128xf32> -> vector<128x128xf32>
    %c0_4 = arith.constant 0 : index
    %c0_5 = arith.constant 0 : index
    %6 = vector.load %arg4[%c0_4, %c0_5] : memref<128x1xf32, #tpu.memory_space<vmem>>, vector<128x1xf32>
    %c0_6 = arith.constant 0 : index
    %c0_7 = arith.constant 0 : index
    %7 = vector.load %arg5[%c0_6, %c0_7] : memref<1x128xf32, #tpu.memory_space<vmem>>, vector<1x128xf32>
    %8 = vector.broadcast %6 : vector<128x1xf32> to vector<128x128xf32>
    %9 = arith.subf %5, %8 : vector<128x128xf32>
    %cst_8 = arith.constant 1.000000e+00 : f32
    %10 = vector.broadcast %cst_8 : f32 to vector<128x128xf32>
    %11 = arith.addf %9, %10 : vector<128x128xf32>
    %cst_9 = arith.constant 0.000000e+00 : f32
    %12 = vector.broadcast %cst_9 : f32 to vector<128x128xf32>
    %13 = arith.maximumf %11, %12 : vector<128x128xf32>
    %14 = vector.broadcast %7 : vector<1x128xf32> to vector<128x128xf32>
    %15 = arith.subf %5, %14 : vector<128x128xf32>
    %cst_10 = arith.constant 1.000000e+00 : f32
    %16 = vector.broadcast %cst_10 : f32 to vector<128x128xf32>
    %17 = arith.addf %15, %16 : vector<128x128xf32>
    %cst_11 = arith.constant 0.000000e+00 : f32
    %18 = vector.broadcast %cst_11 : f32 to vector<128x128xf32>
    %19 = arith.maximumf %17, %18 : vector<128x128xf32>
    %20 = arith.addf %13, %19 : vector<128x128xf32>
    %cst_12 = arith.constant 0.000000e+00 : f32
    %21 = vector.broadcast %cst_12 : f32 to vector<128x128xf32>
    %22 = arith.cmpf ogt, %9, %21 : vector<128x128xf32>
    %cst_13 = arith.constant 1.000000e+00 : f32
    %cst_14 = arith.constant 0.000000e+00 : f32
    %23 = vector.broadcast %cst_13 : f32 to vector<128x128xf32>
    %24 = vector.broadcast %cst_14 : f32 to vector<128x128xf32>
    %25 = arith.select %22, %23, %24 : vector<128x128xi1>, vector<128x128xf32>
    %c0_15 = arith.constant 0 : index
    %c0_16 = arith.constant 0 : index
    %26 = vector.load %arg6[%c0_15, %c0_16] : memref<128x1xf32, #tpu.memory_space<vmem>>, vector<128x1xf32>
    %c0_17 = arith.constant 0 : index
    %c0_18 = arith.constant 0 : index
    %27 = vector.load %arg7[%c0_17, %c0_18] : memref<1x128xf32, #tpu.memory_space<vmem>>, vector<1x128xf32>
    %28 = vector.broadcast %26 : vector<128x1xf32> to vector<128x128xf32>
    %29 = vector.broadcast %27 : vector<1x128xf32> to vector<128x128xf32>
    %30 = arith.mulf %28, %29 : vector<128x128xf32>
    %31 = arith.mulf %20, %30 : vector<128x128xf32>
    %c0_19 = arith.constant 0 : index
    %c0_20 = arith.constant 0 : index
    %32 = vector.load %arg7[%c0_19, %c0_20] : memref<1x128xf32, #tpu.memory_space<vmem>>, vector<1x128xf32>
    %33 = vector.broadcast %32 : vector<1x128xf32> to vector<128x128xf32>
    %34 = arith.mulf %25, %33 : vector<128x128xf32>
    %35 = arith.cmpi ne, %arg0, %arg1 : i32
    %36 = arith.extui %35 : i1 to i32
    %c0_i32_21 = arith.constant 0 : i32
    %37 = arith.cmpi ne, %36, %c0_i32_21 : i32
    scf.if %37 {
      %c0_23 = arith.constant 0 : index
      %c0_24 = arith.constant 0 : index
      %41 = vector.load %arg8[%c0_23, %c0_24] : memref<128x128xf32, #tpu.memory_space<vmem>>, vector<128x128xf32>
      %42 = arith.addf %41, %31 : vector<128x128xf32>
      %c0_25 = arith.constant 0 : index
      %c0_26 = arith.constant 0 : index
      %43 = vector.load %arg8[%c0_25, %c0_26] : memref<128x128xf32, #tpu.memory_space<vmem>>, vector<128x128xf32>
      tpu.vector_store %arg8[%c0_25, %c0_26], %42 {strides = array<i32>} : memref<128x128xf32, #tpu.memory_space<vmem>>, vector<128x128xf32>,
      %c0_27 = arith.constant 0 : index
      %c0_28 = arith.constant 0 : index
      %44 = vector.load %arg9[%c0_27, %c0_28] : memref<128x128xf32, #tpu.memory_space<vmem>>, vector<128x128xf32>
      %45 = arith.addf %44, %34 : vector<128x128xf32>
      %c0_29 = arith.constant 0 : index
      %c0_30 = arith.constant 0 : index
      %46 = vector.load %arg9[%c0_29, %c0_30] : memref<128x128xf32, #tpu.memory_space<vmem>>, vector<128x128xf32>
      tpu.vector_store %arg9[%c0_29, %c0_30], %45 {strides = array<i32>} : memref<128x128xf32, #tpu.memory_space<vmem>>, vector<128x128xf32>,
    } else {
    }
    %38 = arith.cmpi eq, %arg0, %arg1 : i32
    %39 = arith.extui %38 : i1 to i32
    %c0_i32_22 = arith.constant 0 : i32
    %40 = arith.cmpi ne, %39, %c0_i32_22 : i32
    scf.if %40 {
      %41 = tpu.iota {dimensions = array<i32: 0>} : vector<128x128xi32>
      %42 = tpu.iota {dimensions = array<i32: 1>} : vector<128x128xi32>
      %43 = arith.cmpi ne, %41, %42 : vector<128x128xi32>
      %cst_23 = arith.constant 1.000000e+00 : f32
      %cst_24 = arith.constant 0.000000e+00 : f32
      %44 = vector.broadcast %cst_23 : f32 to vector<128x128xf32>
      %45 = vector.broadcast %cst_24 : f32 to vector<128x128xf32>
      %46 = arith.select %43, %44, %45 : vector<128x128xi1>, vector<128x128xf32>
      %c0_25 = arith.constant 0 : index
      %c0_26 = arith.constant 0 : index
      %47 = vector.load %arg8[%c0_25, %c0_26] : memref<128x128xf32, #tpu.memory_space<vmem>>, vector<128x128xf32>
      %48 = arith.mulf %31, %46 : vector<128x128xf32>
      %49 = arith.addf %47, %48 : vector<128x128xf32>
      %c0_27 = arith.constant 0 : index
      %c0_28 = arith.constant 0 : index
      %50 = vector.load %arg8[%c0_27, %c0_28] : memref<128x128xf32, #tpu.memory_space<vmem>>, vector<128x128xf32>
      tpu.vector_store %arg8[%c0_27, %c0_28], %49 {strides = array<i32>} : memref<128x128xf32, #tpu.memory_space<vmem>>, vector<128x128xf32>,
      %c0_29 = arith.constant 0 : index
      %c0_30 = arith.constant 0 : index
      %51 = vector.load %arg9[%c0_29, %c0_30] : memref<128x128xf32, #tpu.memory_space<vmem>>, vector<128x128xf32>
      %52 = arith.mulf %34, %46 : vector<128x128xf32>
      %53 = arith.addf %51, %52 : vector<128x128xf32>
      %c0_31 = arith.constant 0 : index
      %c0_32 = arith.constant 0 : index
      %54 = vector.load %arg9[%c0_31, %c0_32] : memref<128x128xf32, #tpu.memory_space<vmem>>, vector<128x128xf32>
      tpu.vector_store %arg9[%c0_31, %c0_32], %53 {strides = array<i32>} : memref<128x128xf32, #tpu.memory_space<vmem>>, vector<128x128xf32>,
    } else {
    }
    return
  }
  func.func @transform_0(%arg0: i32, %arg1: i32) -> (i32, i32) {
    %c0_i32 = arith.constant 0 : i32
    %c0_i32_0 = arith.constant 0 : i32
    return %arg0, %c0_i32 : i32, i32
  }
  func.func @transform_1(%arg0: i32, %arg1: i32) -> (i32, i32) {
    %c0_i32 = arith.constant 0 : i32
    %c0_i32_0 = arith.constant 0 : i32
    return %arg1, %c0_i32 : i32, i32
  }
  func.func @transform_2(%arg0: i32, %arg1: i32) -> (i32, i32) {
    %c0_i32 = arith.constant 0 : i32
    %c0_i32_0 = arith.constant 0 : i32
    return %arg0, %c0_i32 : i32, i32
  }
  func.func @transform_3(%arg0: i32, %arg1: i32) -> (i32, i32) {
    %c0_i32 = arith.constant 0 : i32
    %c0_i32_0 = arith.constant 0 : i32
    return %c0_i32, %arg1 : i32, i32
  }
  func.func @transform_4(%arg0: i32, %arg1: i32) -> (i32, i32) {
    %c0_i32 = arith.constant 0 : i32
    %c0_i32_0 = arith.constant 0 : i32
    return %arg0, %c0_i32 : i32, i32
  }
  func.func @transform_5(%arg0: i32, %arg1: i32) -> (i32, i32) {
    %c0_i32 = arith.constant 0 : i32
    %c0_i32_0 = arith.constant 0 : i32
    return %c0_i32, %arg1 : i32, i32
  }
  func.func @transform_6(%arg0: i32, %arg1: i32) -> (i32, i32) {
    %c0_i32 = arith.constant 0 : i32
    %c0_i32_0 = arith.constant 0 : i32
    return %arg0, %c0_i32 : i32, i32
  }
  func.func @transform_7(%arg0: i32, %arg1: i32) -> (i32, i32) {
    %c0_i32 = arith.constant 0 : i32
    %c0_i32_0 = arith.constant 0 : i32
    return %arg0, %c0_i32 : i32, i32
  }
}

</mosaic_0001>

<bundles_post_ra>
// kernel: tpu_custom_call.1
= control target key start
LH: loop header
LB: loop body
LE: loop exit
PB: predicated region body
PF: predicated region fallthrough
CT: control target
= control target key end

     0   :  { %13 = vsyncpa [#allocation3], 0  ;;  %v1152_v2 = vmov 0   ;;  %s1632_s0 = inlined_call_operand.vmem [shape: bf16[128,128], index: 0, kind: input, shape index: {}]   ;;  %s1633_s1 = inlined_call_operand.vmem [shape: bf16[128,128], index: 1, kind: input, shape index: {}]   ;;  %s1634_s2 = inlined_call_operand.vmem [shape: f32[128,1], index: 2, kind: input, shape index: {}]   ;;  %s1635_s3 = inlined_call_operand.vmem [shape: f32[1,128], index: 3, kind: input, shape index: {}]   ;;  %s1636_s4 = inlined_call_operand.vmem [shape: f32[128,1], index: 4, kind: input, shape index: {}]   ;;  %s1637_s5 = inlined_call_operand.vmem [shape: f32[1,128], index: 5, kind: input, shape index: {}]   ;;  %s1638_s6 = inlined_call_operand.hbm [shape: f32[128,128], index: 6, kind: output, shape index: {0}]   ;;  %s1639_s7 = inlined_call_operand.hbm [shape: f32[128,128], index: 7, kind: output, shape index: {1}]  }
   0x1   :  { %v1092_v0 = vld [vmem:[%s1633_s1 + $0x38] sm:$0xff]   ;;  %v1093_v1 = vld [vmem:[%s1633_s1 + $0x30] sm:$0xff]   ;;  %1091 = vset.pattern.permute.xlu1 %v1152_v2  ;;  %1090 = vset.pattern.permute.xlu0 %v1152_v2  ;;  %v289_v4 = vld [vmem:[%s1634_s2] sm:$0xff] }
   0x2   :  { %1036 = vmatprep.subr.bf16.mxu0 %v1092_v0  ;;  %1068 = vmatprep.subr.bf16.mxu1 %v1092_v0  ;;  %v291_v3 = vld [vmem:[%s1634_s2 + $0x10] sm:$0xff]  ;;  %v292_v5 = vld [vmem:[%s1634_s2 + $0x18] sm:$0xff]  ;;  %v290_v6 = vld [vmem:[%s1634_s2 + $0x8] sm:$0xff] }
   0x3   :  { %1037 = vmatpush3.bf16.xpose.msra.mxu0 %v1092_v0  ;;  %1076 = vmatpush3.bf16.xpose.msra.mxu1 %v1092_v0  ;;  %v1094_v7 = vld [vmem:[%s1633_s1 + $0x28] sm:$0xff]   ;;  %v293_v9 = vld [vmem:[%s1634_s2 + $0x20] sm:$0xff]  ;;  %v296_v10 = vld [vmem:[%s1634_s2 + $0x38] sm:$0xff] }
   0x4   :  { %1038 = vmatprep.subr.bf16.mxu0 %v1093_v1  ;;  %1069 = vmatprep.subr.bf16.mxu1 %v1093_v1  ;;  %v294_v8 = vld [vmem:[%s1634_s2 + $0x28] sm:$0xff]  ;;  %v295_v11 = vld [vmem:[%s1634_s2 + $0x30] sm:$0xff]  ;;  %v1100_v12 = vld [vmem:[%s1632_s0] sm:$0xff]  }
   0x5   :  { %318 = vperm.xlu1 %1091, %v291_v3   ;;  %308 = vperm.xlu0 %1090, %v289_v4   ;;  %v1101_v13 = vld [vmem:[%s1632_s0 + $0x20] sm:$0xff]   ;;  %v298_v15 = vld [vmem:[%s1634_s2 + $0x48] sm:$0xff]  ;;  %v300_v17 = vld [vmem:[%s1634_s2 + $0x58] sm:$0xff] }
   0x6   :  { %v1095_v14 = vld [vmem:[%s1633_s1 + $0x20] sm:$0xff]   ;;  %1052 = vmatprep.mubr.bf16.mxu0 %v1100_v12  ;;  %1060 = vmatprep.mubr.bf16.mxu1 %v1101_v13  ;;  %v299_v18 = vld [vmem:[%s1634_s2 + $0x50] sm:$0xff]  ;;  %v1096_v19 = vld [vmem:[%s1633_s1 + $0x18] sm:$0xff]  }
   0x7   :  { %v297_v16 = vld [vmem:[%s1634_s2 + $0x40] sm:$0xff] }
   0x9   :  { %323 = vperm.xlu1 %1091, %v292_v5   ;;  %313 = vperm.xlu0 %1090, %v290_v6  }
   0xb   :  { %1039 = vmatpush3.bf16.xpose.msra.mxu0 %v1093_v1  ;;  %1077 = vmatpush3.bf16.xpose.msra.mxu1 %v1093_v1 }
   0xc   :  { %1040 = vmatprep.subr.bf16.mxu0 %v1094_v7  ;;  %1070 = vmatprep.subr.bf16.mxu1 %v1094_v7 }
   0xd   :  { %333 = vperm.xlu1 %1091, %v294_v8   ;;  %328 = vperm.xlu0 %1090, %v293_v9  }
  0x11   :  { %343 = vperm.xlu1 %1091, %v296_v10   ;;  %338 = vperm.xlu0 %1090, %v295_v11  }
  0x13   :  { %1041 = vmatpush3.bf16.xpose.msra.mxu0 %v1094_v7  ;;  %1078 = vmatpush3.bf16.xpose.msra.mxu1 %v1094_v7 }
  0x14   :  { %1042 = vmatprep.subr.bf16.mxu0 %v1095_v14  ;;  %1071 = vmatprep.subr.bf16.mxu1 %v1095_v14 }
  0x15   :  { %353 = vperm.xlu1 %1091, %v298_v15   ;;  %348 = vperm.xlu0 %1090, %v297_v16  }
  0x19   :  { %363 = vperm.xlu1 %1091, %v300_v17   ;;  %358 = vperm.xlu0 %1090, %v299_v18  }
  0x1a   :  { %14 = vsyncpa [#allocation5], 0  ;;  %v302_v20 = vld [vmem:[%s1634_s2 + $0x68] sm:$0xff]  ;;  %v301_v21 = vld [vmem:[%s1634_s2 + $0x60] sm:$0xff]  ;;  %v791_v9 = vlaneseq  ;;  %s1155_s27 = smov [#allocation2]  }
  0x1b   :  { %1043 = vmatpush3.bf16.xpose.msra.mxu0 %v1095_v14  ;;  %1079 = vmatpush3.bf16.xpose.msra.mxu1 %v1095_v14  ;;  %v304_v22 = vld [vmem:[%s1634_s2 + $0x78] sm:$0xff]  ;;  %v303_v23 = vld [vmem:[%s1634_s2 + $0x70] sm:$0xff]  ;;  %v537_v25 = vld [vmem:[%s1636_s4 + $0x8] sm:$0xff] }
  0x1c   :  { %1044 = vmatprep.subr.bf16.mxu0 %v1096_v19  ;;  %1072 = vmatprep.subr.bf16.mxu1 %v1096_v19  ;;  %v1097_v24 = vld [vmem:[%s1633_s1 + $0x10] sm:$0xff]   ;;  %v536_v26 = vld [vmem:[%s1636_s4] sm:$0xff]  ;;  %v539_v27 = vld [vmem:[%s1636_s4 + $0x18] sm:$0xff]  ;;  %v1374_v10 = vshrl.u32 %v791_v9, 7  ;;  %v1377_v14 = vand.u32 127, %v791_v9 }
  0x1d   :  { %373 = vperm.xlu1 %1091, %v302_v20   ;;  %368 = vperm.xlu0 %1090, %v301_v21   ;;  %v538_v28 = vld [vmem:[%s1636_s4 + $0x10] sm:$0xff]  ;;  %v1098_v29 = vld [vmem:[%s1633_s1 + $0x8] sm:$0xff]   ;;  %v540_v31 = vld [vmem:[%s1636_s4 + $0x20] sm:$0xff] }
  0x1e   :  { %v541_v30 = vld [vmem:[%s1636_s4 + $0x28] sm:$0xff]  ;;  %v543_v32 = vld [vmem:[%s1636_s4 + $0x38] sm:$0xff]  ;;  %v542_v33 = vld [vmem:[%s1636_s4 + $0x30] sm:$0xff]  ;;  %v794_v13 = vadd.s32 16, %v1374_v10  ;;  %v802_v15 = vadd.s32 80, %v1374_v10  ;;  %v800_v16 = vadd.s32 64, %v1374_v10  ;;  %vm810_vm2 = vcmp.ne.s32.totalorder %v1374_v10, %v1377_v14 }
  0x1f   :  { %v1099_v34 = vld [vmem:[%s1633_s1] sm:$0xff]   ;;  %v545_v35 = vld [vmem:[%s1636_s4 + $0x48] sm:$0xff]  ;;  %v547_v37 = vld [vmem:[%s1636_s4 + $0x58] sm:$0xff]  ;;  %v795_v17 = vadd.s32 24, %v1374_v10  ;;  %v803_v18 = vadd.s32 88, %v1374_v10  ;;  %v793_v21 = vadd.s32 8, %v1374_v10 }
  0x20   :  { %v544_v36 = vld [vmem:[%s1636_s4 + $0x40] sm:$0xff]  ;;  %v546_v38 = vld [vmem:[%s1636_s4 + $0x50] sm:$0xff]  ;;  %v549_v39 = vld [vmem:[%s1636_s4 + $0x68] sm:$0xff]  ;;  %vm812_vm0 = vcmp.ne.s32.totalorder %v794_v13, %v1377_v14  ;;  %vm820_vm1 = vcmp.ne.s32.totalorder %v802_v15, %v1377_v14  ;;  %vm818_vm3 = vcmp.ne.s32.totalorder %v800_v16, %v1377_v14  ;;  %s975_s1 = sshll.u32 %s1155_s27, 4  ;;  %s976_s1 = int_to_ptr.vmem [resolvable:$true] %s975_s1 }
  0x21   :  { %383 = vperm.xlu1 %1091, %v304_v22   ;;  %378 = vperm.xlu0 %1090, %v303_v23   ;;  %v548_v40 = vld [vmem:[%s1636_s4 + $0x60] sm:$0xff]  ;;  %v1102_v41 = vld [vmem:[%s1632_s0 + $0x8] sm:$0xff]   ;;  %v1104_v43 = vld [vmem:[%s1632_s0 + $0x10] sm:$0xff]   ;;  %v801_v22 = vadd.s32 72, %v1374_v10  ;;  %v798_v23 = vadd.s32 48, %v1374_v10  ;;  %vm813_vm4 = vcmp.ne.s32.totalorder %v795_v17, %v1377_v14  ;;  %vm821_vm5 = vcmp.ne.s32.totalorder %v803_v18, %v1377_v14 }
  0x22   :  { %v1103_v42 = vld [vmem:[%s1632_s0 + $0x28] sm:$0xff]   ;;  %v1105_v44 = vld [vmem:[%s1632_s0 + $0x30] sm:$0xff]   ;;  %v551_v45 = vld [vmem:[%s1636_s4 + $0x78] sm:$0xff]  ;;  %vm811_vm6 = vcmp.ne.s32.totalorder %v793_v21, %v1377_v14 }
  0x23   :  { %1045 = vmatpush3.bf16.xpose.msra.mxu0 %v1096_v19  ;;  %1080 = vmatpush3.bf16.xpose.msra.mxu1 %v1096_v19  ;;  %v550_v46 = vld [vmem:[%s1636_s4 + $0x70] sm:$0xff]  ;;  %v1106_v47 = vld [vmem:[%s1632_s0 + $0x18] sm:$0xff]   ;;  %vm819_vm7 = vcmp.ne.s32.totalorder %v801_v22, %v1377_v14  ;;  %vm816_vm8 = vcmp.ne.s32.totalorder %v798_v23, %v1377_v14 }
  0x24   :  { %1046 = vmatprep.subr.bf16.mxu0 %v1097_v24  ;;  %1073 = vmatprep.subr.bf16.mxu1 %v1097_v24  ;;  %v1107_v48 = vld [vmem:[%s1632_s0 + $0x38] sm:$0xff]  }
  0x25   :  { %560 = vperm.xlu1 %1091, %v537_v25   ;;  %555 = vperm.xlu0 %1090, %v536_v26   ;;  %v806_v26 = vadd.s32 112, %v1374_v10 }
  0x27   :  { %vm824_vm9 = vcmp.ne.s32.totalorder %v806_v26, %v1377_v14 }
  0x29   :  { %570 = vperm.xlu1 %1091, %v539_v27   ;;  %565 = vperm.xlu0 %1090, %v538_v28   ;;  %v1400_v27 = vld [vmem:[%s1637_s5] ss:$0 sm:$0xff]  ;;  %v796_v28 = vadd.s32 32, %v1374_v10 }
  0x2b   :  { %1047 = vmatpush3.bf16.xpose.msra.mxu0 %v1097_v24  ;;  %1081 = vmatpush3.bf16.xpose.msra.mxu1 %v1097_v24  ;;  %v1153_v24 = vmov 0.0   ;;  %vm814_vm10 = vcmp.ne.s32.totalorder %v796_v28, %v1377_v14 }
  0x2c   :  { %1048 = vmatprep.subr.bf16.mxu0 %v1098_v29  ;;  %1074 = vmatprep.subr.bf16.mxu1 %v1098_v29  ;;  %v1392_v25 = vsel %vm812_vm0, 1.0, %v1153_v24 }
  0x2d   :  { %580 = vperm.xlu1 %1091, %v541_v30   ;;  %575 = vperm.xlu0 %1090, %v540_v31   ;;  %v1407_v30 = vsel %vm820_vm1, 1.0, %v1153_v24  ;;  %v1410_v31 = vsel %vm810_vm2, 1.0, %v1153_v24 }
  0x31   :  { %590 = vperm.xlu1 %1091, %v543_v32   ;;  %585 = vperm.xlu0 %1090, %v542_v33   ;;  %v1413_v32 = vsel %vm818_vm3, 1.0, %v1153_v24  ;;  %v799_v33 = vadd.s32 56, %v1374_v10 }
  0x33   :  { %1049 = vmatpush3.bf16.xpose.msra.mxu0 %v1098_v29  ;;  %1082 = vmatpush3.bf16.xpose.msra.mxu1 %v1098_v29  ;;  %v804_v29 = vadd.s32 96, %v1374_v10  ;;  %vm817_vm12 = vcmp.ne.s32.totalorder %v799_v33, %v1377_v14 }
  0x34   :  { %1050 = vmatprep.subr.bf16.mxu0 %v1099_v34  ;;  %1075 = vmatprep.subr.bf16.mxu1 %v1099_v34  ;;  %v1484_v15 = vsel %vm817_vm12, 1.0, %v1153_v24 }
  0x35   :  { %600 = vperm.xlu1 %1091, %v545_v35   ;;  %595 = vperm.xlu0 %1090, %v544_v36   ;;  %v1419_v36 = vsel %vm813_vm4, 1.0, %v1153_v24  ;;  %vm822_vm11 = vcmp.ne.s32.totalorder %v804_v29, %v1377_v14 }
  0x39   :  { %610 = vperm.xlu1 %1091, %v547_v37   ;;  %605 = vperm.xlu0 %1090, %v546_v38   ;;  %v1422_v37 = vsel %vm821_vm5, 1.0, %v1153_v24  ;;  %v807_v38 = vadd.s32 120, %v1374_v10 }
  0x3b   :  { %1051 = vmatpush3.bf16.xpose.msra.mxu0 %v1099_v34  ;;  %1083 = vmatpush3.bf16.xpose.msra.mxu1 %v1099_v34  ;;  %vm825_vm13 = vcmp.ne.s32.totalorder %v807_v38, %v1377_v14 }
  0x3d   :  { %620 = vperm.xlu1 %1091, %v549_v39   ;;  %615 = vperm.xlu0 %1090, %v548_v40   ;;  %v1430_v40 = vsel %vm811_vm6, 1.0, %v1153_v24 }
  0x41   :  { %630 = vperm.xlu1 %1091, %v551_v45   ;;  %625 = vperm.xlu0 %1090, %v550_v46   ;;  %v1447_v46 = vsel %vm816_vm8, 1.0, %v1153_v24 }
  0x42   :  { %1053 = vmatmul.mubr.bf16.vlgmr.msra.gmra.mxu0 %v1102_v41  ;;  %1061 = vmatmul.mubr.bf16.vlgmr.msra.gmra.mxu1 %v1103_v42  ;;  %v1433_v41 = vsel %vm819_vm7, 1.0, %v1153_v24 }
  0x43   :  { %1056 = vmatprep.mubr.bf16.mxu0 %v1104_v43  ;;  %1064 = vmatprep.mubr.bf16.mxu1 %v1105_v44  ;;  %v797_v43 = vadd.s32 40, %v1374_v10 }
  0x45   :  { %vm815_vm14 = vcmp.ne.s32.totalorder %v797_v43, %v1377_v14 }
  0x46   :  { %v1510_v33 = vsel %vm815_vm14, 1.0, %v1153_v24 }
  0x47   :  { %1649 = vst [vmem:[#allocation15_spill] sm:$0xff] %v1510_v33 }
  0x4a   :  { %1057 = vmatmul.mubr.bf16.gmra.mxu0 %v1106_v47  ;;  %1065 = vmatmul.mubr.bf16.gmra.mxu1 %v1107_v48 }
  0x80   :  { %v1342_v49 = vpop.permute.xlu1 %318  ;;  %v1344_v50 = vpop.permute.xlu0 %308 }
  0x84   :  { %v1346_v51 = vpop.permute.xlu1 %323  ;;  %v1348_v52 = vpop.permute.xlu0 %313 }
  0x88   :  { %v1350_v53 = vpop.permute.xlu1 %333  ;;  %v1352_v54 = vpop.permute.xlu0 %328 }
  0x89   :  { %1642 = vst [vmem:[#allocation8_spill] sm:$0xff] %v1350_v53 }
  0x8c   :  { %v1354_v55 = vpop.permute.xlu1 %343  ;;  %v1356_v56 = vpop.permute.xlu0 %338 }
  0x90   :  { %v1358_v57 = vpop.permute.xlu1 %353  ;;  %v1360_v58 = vpop.permute.xlu0 %348 }
  0x94   :  { %v1362_v59 = vpop.permute.xlu1 %363  ;;  %v1364_v60 = vpop.permute.xlu0 %358 }
  0x98   :  { %v1366_v61 = vpop.permute.xlu1 %373  ;;  %v1368_v62 = vpop.permute.xlu0 %368 }
  0x99   :  { %1643 = vst [vmem:[#allocation9_spill] sm:$0xff] %v1366_v61 }
  0x9c   :  { %v1370_v63 = vpop.permute.xlu1 %383  ;;  %v1372_v0 = vpop.permute.xlu0 %378 }
  0xa0   :  { %v561_v1 = vpop.permute.xlu1 %560  ;;  %v556_v2 = vpop.permute.xlu0 %555 }
  0xa1   :  { %v1427_v39 = vmul.f32 %v1400_v27, %v561_v1  ;;  %v1437_v42 = vmul.f32 %v1400_v27, %v556_v2  ;;  %v1457_v1 = vsel %vm824_vm9, 1.0, %v1153_v24 }
  0xa4   :  { %v571_v3 = vpop.permute.xlu1 %570  ;;  %v566_v4 = vpop.permute.xlu0 %565 }
  0xa5   :  { %v1443_v44 = vmul.f32 %v1400_v27, %v571_v3  ;;  %v641_v45 = vmul.f32 %v1400_v27, %v566_v4  ;;  %v1469_v4 = vld [vmem:[%s1635_s3] ss:$0 sm:$0xff]  ;;  %s1154_s3 = smov [#allocation4]  }
  0xa6   :  { %s987_s26 = sshll.u32 %s1154_s3, 4  ;;  %s988_s26 = int_to_ptr.vmem [resolvable:$true] %s987_s26 }
  0xa7   :  { %s1108_s28 = scalar_lea.vmem %s988_s26, 2048  ;;  %p1113_p1 = scmp.lt.s32.totalorder %s988_s26, %s988_s26 }
  0xa8   :  { %v581_v5 = vpop.permute.xlu1 %580  ;;  %v576_v6 = vpop.permute.xlu0 %575  ;;  %p1109_p0 = scmp.ne.s32.totalorder %s988_s26, %s1108_s28  ;;  %p1114_p2 = scmp.lt.s32.totalorder %s1108_s28, %s1108_s28 }
  0xa9   :  { %v1451_v47 = vmul.f32 %v1400_v27, %v581_v5  ;;  %v1454_v48 = vmul.f32 %v1400_v27, %v576_v6  ;;  %v1472_v5 = vsel %vm814_vm10, 1.0, %v1153_v24  ;;  %v1475_v6 = vsel %vm822_vm11, 1.0, %v1153_v24 }
  0xaa   :  { %p1115_p3 = por %p1114_p2, %p1113_p1 }
  0xab   :  { %1645 = vst [vmem:[#allocation11_spill] sm:$0xff] %v1451_v47 }
  0xac   :  { %v591_v7 = vpop.permute.xlu1 %590  ;;  %v586_v8 = vpop.permute.xlu0 %585  ;;  %p1116_p4 = pnand %p1115_p3, %p1109_p0 }
  0xad   :  { %v1461_v2 = vmul.f32 %v1400_v27, %v591_v7  ;;  %v1464_v3 = vmul.f32 %v1400_v27, %v586_v8 }
  0xaf   :  { %1646 = vst [vmem:[#allocation12_spill] sm:$0xff] %v1461_v2 }
  0xb0   :  { %v601_v11 = vpop.permute.xlu1 %600  ;;  %v596_v12 = vpop.permute.xlu0 %595 }
  0xb1   :  { %v1478_v9 = vmul.f32 %v1400_v27, %v601_v11  ;;  %v1481_v7 = vmul.f32 %v1400_v27, %v596_v12  ;;  %v1497_v12 = vsel %vm825_vm13, 1.0, %v1153_v24 }
  0xb2   :  { %1647 = vst [vmem:[#allocation13_spill] sm:$0xff] %v1497_v12 }
  0xb4   :  { %v611_v19 = vpop.permute.xlu1 %610  ;;  %v606_v20 = vpop.permute.xlu0 %605 }
  0xb5   :  { %v1488_v16 = vmul.f32 %v1400_v27, %v611_v19  ;;  %v649_v17 = vmul.f32 %v1400_v27, %v606_v20 }
  0xb8   :  { %v1416_v34 = vpop.permute.xlu1 %620  ;;  %v616_v35 = vpop.permute.xlu0 %615 }
  0xb9   :  { %1644 = vst [vmem:[#allocation10_spill] sm:$0xff] %v1416_v34  ;;  %v1492_v18 = vmul.f32 %v1400_v27, %v616_v35  ;;  %v1513_v35 = vadd.s32 104, %v1374_v10 }
  0xbb   :  { %vm823_vm12 = vcmp.ne.s32.totalorder %v1513_v35, %v1377_v14 }
  0xbc   :  { %v631_v13 = vpop.permute.xlu1 %630  ;;  %v626_v8 = vpop.permute.xlu0 %625 }
  0xbd   :  { %v1504_v20 = vmul.f32 %v1400_v27, %v631_v13  ;;  %v1507_v28 = vmul.f32 %v1400_v27, %v626_v8 }
  0xbf   :  { %1648 = vst [vmem:[#allocation14_spill] sm:$0xff] %v1504_v20 }
 0x102   :  { %v1054_v11 = vpop.f32.mrf.mxu0  ;;  %v1062_v21 = vpop.f32.mrf.mxu1 }
 0x103   :  { %v388_v22 = vsub.f32 %v1054_v11, %v1342_v49  ;;  %v442_v23 = vsub.f32 %v1054_v11, %v1469_v4  ;;  %v396_v26 = vsub.f32 %v1062_v21, %v1364_v60  ;;  %v450_v19 = vsub.f32 %v1062_v21, %v1469_v4 }
 0x104   :  { %v226_v29 = vpop.f32.mrf.mxu0 }
 0x105   :  { %v404_v49 = vadd.f32 1.0, %v388_v22  ;;  %v458_v38 = vadd.f32 1.0, %v442_v23  ;;  %vm506_vm15 = vcmp.gt.f32.partialorder %v388_v22, 0.0  ;;  %v412_v43 = vadd.f32 1.0, %v396_v26 }
 0x106   :  { %v522_v60 = vsel %vm506_vm15, 1.0, %v1153_v24  ;;  %v466_v11 = vadd.f32 1.0, %v450_v19  ;;  %vm514_vm0 = vcmp.gt.f32.partialorder %v396_v26, 0.0  ;;  %v386_v13 = vsub.f32 %v226_v29, %v1344_v50  ;;  %v258_v26 = vpop.f32.mrf.mxu1 }
 0x107   :  { %v420_v21 = vmax.f32 %v404_v49, 0.0  ;;  %v474_v8 = vmax.f32 %v458_v38, 0.0  ;;  %v673_v34 = vmul.f32 %v1400_v27, %v522_v60  ;;  %v428_v47 = vmax.f32 %v412_v43, 0.0  ;;  %v1055_v60 = vpop.f32.mrf.mxu0 }
 0x108   :  { %v482_v20 = vmax.f32 %v466_v11, 0.0  ;;  %v530_v33 = vsel %vm514_vm0, 1.0, %v1153_v24  ;;  %v402_v10 = vadd.f32 1.0, %v386_v13  ;;  %v440_v12 = vsub.f32 %v226_v29, %v1469_v4 }
 0x109   :  { %v490_v23 = vadd.f32 %v474_v8, %v420_v21  ;;  %v924_v22 = vmul.f32 %v1392_v25, %v673_v34  ;;  %v681_v61 = vmul.f32 %v1400_v27, %v530_v33  ;;  %vm504_vm1 = vcmp.gt.f32.partialorder %v386_v13, 0.0 }
 0x10a   :  { %v498_v19 = vadd.f32 %v482_v20, %v428_v47  ;;  %v418_v50 = vmax.f32 %v402_v10, 0.0  ;;  %v456_v49 = vadd.f32 1.0, %v440_v12  ;;  %v520_v38 = vsel %vm504_vm1, 1.0, %v1153_v24 }
 0x10b   :  { %v657_v43 = vmul.f32 %v641_v45, %v490_v23  ;;  %v932_v11 = vmul.f32 %v1407_v30, %v681_v61  ;;  %v671_v2 = vmul.f32 %v1400_v27, %v520_v38  ;;  %v394_v21 = vsub.f32 %v258_v26, %v1360_v58  ;;  %956 = vst [vmem:[#allocation4 + $0x10] sm:$0xff] %v924_v22  ;;  %v1063_v23 = vpop.f32.mrf.mxu1 }
 0x10c   :  { %v665_v53 = vmul.f32 %v649_v17, %v498_v19  ;;  %v472_v29 = vmax.f32 %v456_v49, 0.0  ;;  %v448_v34 = vsub.f32 %v258_v26, %v1469_v4  ;;  %v389_v12 = vsub.f32 %v1055_v60, %v1346_v51 }
 0x10d   :  { %v860_v33 = vmul.f32 %v1392_v25, %v657_v43  ;;  %v922_v47 = vmul.f32 %v1410_v31, %v671_v2  ;;  %v410_v13 = vadd.f32 1.0, %v394_v21  ;;  %964 = vst [vmem:[#allocation4 + $0x50] sm:$0xff] %v932_v11  ;;  %vm512_vm2 = vcmp.gt.f32.partialorder %v394_v21, 0.0 }
 0x10e   :  { %v868_v20 = vmul.f32 %v1407_v30, %v665_v53  ;;  %v488_v45 = vadd.f32 %v472_v29, %v418_v50  ;;  %v464_v61 = vadd.f32 1.0, %v448_v34  ;;  %v405_v17 = vadd.f32 1.0, %v389_v12  ;;  %v229_v53 = vpop.f32.mrf.mxu0 }
 0x10f   :  { %v426_v58 = vmax.f32 %v410_v13, 0.0  ;;  %892 = vst [vmem:[#allocation2 + $0x10] sm:$0xff] %v860_v33  ;;  %954 = vst [vmem:[#allocation4] sm:$0xff] %v922_v47  ;;  %v528_v25 = vsel %vm512_vm2, 1.0, %v1153_v24  ;;  %v443_v51 = vsub.f32 %v1055_v60, %v1469_v4  ;;  %vm507_vm3 = vcmp.gt.f32.partialorder %v389_v12, 0.0 }
 0x110   :  { %v655_v8 = vmul.f32 %v1437_v42, %v488_v45  ;;  %v480_v10 = vmax.f32 %v464_v61, 0.0  ;;  %v421_v2 = vmax.f32 %v405_v17, 0.0  ;;  %900 = vst [vmem:[#allocation2 + $0x50] sm:$0xff] %v868_v20  ;;  %v679_v26 = vmul.f32 %v1400_v27, %v528_v25  ;;  %v261_v45 = vpop.f32.mrf.mxu1 }
 0x111   :  { %v523_v42 = vsel %vm507_vm3, 1.0, %v1153_v24  ;;  %v459_v19 = vadd.f32 1.0, %v443_v51  ;;  %v397_v49 = vsub.f32 %v1063_v23, %v1362_v59  ;;  %v451_v38 = vsub.f32 %v1063_v23, %v1469_v4 }
 0x112   :  { %v858_v30 = vmul.f32 %v1410_v31, %v655_v8  ;;  %v496_v22 = vadd.f32 %v480_v10, %v426_v58  ;;  %v674_v50 = vmul.f32 %v1400_v27, %v523_v42  ;;  %v930_v60 = vmul.f32 %v1413_v32, %v679_v26  ;;  %v1058_v26 = vpop.f32.mrf.mxu0 }
 0x113   :  { %v387_v11 = vsub.f32 %v229_v53, %v1348_v52  ;;  %v475_v29 = vmax.f32 %v459_v19, 0.0  ;;  %v413_v21 = vadd.f32 1.0, %v397_v49  ;;  %v467_v34 = vadd.f32 1.0, %v451_v38 }
 0x114   :  { %v663_v43 = vmul.f32 %v1481_v7, %v496_v22  ;;  %v925_v31 = vmul.f32 %v1419_v36, %v674_v50  ;;  %890 = vst [vmem:[#allocation2] sm:$0xff] %v858_v30  ;;  %vm515_vm4 = vcmp.gt.f32.partialorder %v397_v49, 0.0  ;;  %962 = vst [vmem:[#allocation4 + $0x40] sm:$0xff] %v930_v60  ;;  %v441_v52 = vsub.f32 %v229_v53, %v1469_v4 }
 0x115   :  { %v403_v47 = vadd.f32 1.0, %v387_v11  ;;  %v491_v12 = vadd.f32 %v475_v29, %v421_v2  ;;  %v429_v59 = vmax.f32 %v413_v21, 0.0  ;;  %v483_v20 = vmax.f32 %v467_v34, 0.0 }
 0x116   :  { %v866_v33 = vmul.f32 %v1413_v32, %v663_v43  ;;  %v531_v7 = vsel %vm515_vm4, 1.0, %v1153_v24  ;;  %957 = vst [vmem:[#allocation4 + $0x18] sm:$0xff] %v925_v31  ;;  %vm505_vm5 = vcmp.gt.f32.partialorder %v387_v11, 0.0  ;;  %v457_v32 = vadd.f32 1.0, %v441_v52 }
 0x117   :  { %v419_v13 = vmax.f32 %v403_v47, 0.0  ;;  %v658_v61 = vmul.f32 %v1443_v44, %v491_v12  ;;  %v499_v17 = vadd.f32 %v483_v20, %v429_v59  ;;  %v682_v8 = vmul.f32 %v1400_v27, %v531_v7  ;;  %v242_v12 = vpop.f32.mrf.mxu0 }
 0x118   :  { %898 = vst [vmem:[#allocation2 + $0x40] sm:$0xff] %v866_v33  ;;  %v521_v58 = vsel %vm505_vm5, 1.0, %v1153_v24  ;;  %v395_v10 = vsub.f32 %v261_v45, %v1358_v57  ;;  %v449_v23 = vsub.f32 %v261_v45, %v1469_v4  ;;  %v473_v53 = vmax.f32 %v457_v32, 0.0  ;;  %v1066_v57 = vpop.f32.mrf.mxu1 }
 0x119   :  { %v861_v25 = vmul.f32 %v1419_v36, %v658_v61  ;;  %v666_v2 = vmul.f32 %v1488_v16, %v499_v17  ;;  %v933_v51 = vmul.f32 %v1422_v37, %v682_v8  ;;  %v672_v44 = vmul.f32 %v1400_v27, %v521_v58 }
 0x11a   :  { %v411_v30 = vadd.f32 1.0, %v395_v10  ;;  %v465_v22 = vadd.f32 1.0, %v449_v23  ;;  %vm513_vm6 = vcmp.gt.f32.partialorder %v395_v10, 0.0  ;;  %v489_v50 = vadd.f32 %v473_v53, %v419_v13 }
 0x11b   :  { %v869_v42 = vmul.f32 %v1422_v37, %v666_v2  ;;  %v923_v19 = vmul.f32 %v1430_v40, %v672_v44  ;;  %v529_v36 = vsel %vm513_vm6, 1.0, %v1153_v24  ;;  %893 = vst [vmem:[#allocation2 + $0x18] sm:$0xff] %v861_v25  ;;  %965 = vst [vmem:[#allocation4 + $0x58] sm:$0xff] %v933_v51  ;;  %v392_v43 = vsub.f32 %v1058_v26, %v1356_v56 }
 0x11c   :  { %v427_v49 = vmax.f32 %v411_v30, 0.0  ;;  %v481_v38 = vmax.f32 %v465_v22, 0.0  ;;  %v680_v16 = vmul.f32 %v1400_v27, %v529_v36  ;;  %v656_v60 = vmul.f32 %v1427_v39, %v489_v50 }
 0x11d   :  { %v446_v29 = vsub.f32 %v1058_v26, %v1469_v4  ;;  %v400_v37 = vsub.f32 %v1066_v57, %v1372_v0  ;;  %901 = vst [vmem:[#allocation2 + $0x58] sm:$0xff] %v869_v42  ;;  %955 = vst [vmem:[#allocation4 + $0x8] sm:$0xff] %v923_v19  ;;  %v408_v21 = vadd.f32 1.0, %v392_v43  ;;  %vm510_vm7 = vcmp.gt.f32.partialorder %v392_v43, 0.0  ;;  %v1059_v19 = vpop.f32.mrf.mxu0 }
 0x11e   :  { %v497_v11 = vadd.f32 %v481_v38, %v427_v49  ;;  %v931_v31 = vmul.f32 %v1433_v41, %v680_v16  ;;  %v454_v34 = vsub.f32 %v1066_v57, %v1469_v4  ;;  %v859_v33 = vmul.f32 %v1430_v40, %v656_v60 }
 0x11f   :  { %v462_v56 = vadd.f32 1.0, %v446_v29  ;;  %v526_v39 = vsel %vm510_vm7, 1.0, %v1153_v24  ;;  %v424_v59 = vmax.f32 %v408_v21, 0.0  ;;  %v416_v0 = vadd.f32 1.0, %v400_v37 }
 0x120   :  { %v664_v47 = vmul.f32 %v1478_v9, %v497_v11  ;;  %v677_v20 = vmul.f32 %v1400_v27, %v526_v39  ;;  %v470_v13 = vadd.f32 1.0, %v454_v34  ;;  %963 = vst [vmem:[#allocation4 + $0x48] sm:$0xff] %v931_v31  ;;  %vm518_vm8 = vcmp.gt.f32.partialorder %v400_v37, 0.0  ;;  %v274_v9 = vpop.f32.mrf.mxu1  ;;  %891 = vst [vmem:[#allocation2 + $0x8] sm:$0xff] %v859_v33 }
 0x121   :  { %v478_v7 = vmax.f32 %v462_v56, 0.0  ;;  %v432_v61 = vmax.f32 %v416_v0, 0.0  ;;  %v390_v40 = vsub.f32 %v242_v12, %v1352_v54  ;;  %v534_v32 = vsel %vm518_vm8, 1.0, %v1153_v24 }
 0x122   :  { %v867_v45 = vmul.f32 %v1433_v41, %v664_v47  ;;  %v928_v52 = vmul.f32 %v1447_v46, %v677_v20  ;;  %v486_v8 = vmax.f32 %v470_v13, 0.0  ;;  %v685_v58 = vmul.f32 %v1400_v27, %v534_v32  ;;  %v1067_v16 = vpop.f32.mrf.mxu1 }
 0x123   :  { %v494_v17 = vadd.f32 %v478_v7, %v424_v59  ;;  %v406_v10 = vadd.f32 1.0, %v390_v40  ;;  %v444_v41 = vsub.f32 %v242_v12, %v1469_v4  ;;  %vm508_vm9 = vcmp.gt.f32.partialorder %v390_v40, 0.0  ;;  %v245_v59 = vpop.f32.mrf.mxu0  ;;  %v1650_v40 = vld [vmem:[#allocation8_spill] sm:$0xff] }
 0x124   :  { %899 = vst [vmem:[#allocation2 + $0x48] sm:$0xff] %v867_v45  ;;  %v502_v25 = vadd.f32 %v486_v8, %v432_v61  ;;  %v398_v2 = vsub.f32 %v274_v9, %v1368_v62  ;;  %960 = vst [vmem:[#allocation4 + $0x30] sm:$0xff] %v928_v52  ;;  %v936_v54 = vmul.f32 %v1457_v1, %v685_v58  ;;  %v524_v53 = vsel %vm508_vm9, 1.0, %v1153_v24  ;;  %v1652_v58 = vld [vmem:[#allocation9_spill] sm:$0xff] }
 0x125   :  { %v661_v23 = vmul.f32 %v1464_v3, %v494_v17  ;;  %v422_v51 = vmax.f32 %v406_v10, 0.0  ;;  %v460_v44 = vadd.f32 1.0, %v444_v41  ;;  %v675_v26 = vmul.f32 %v1400_v27, %v524_v53  ;;  %v1651_v17 = vld [vmem:[#allocation12_spill] sm:$0xff]  ;;  %v1653_v41 = vld [vmem:[#allocation13_spill] sm:$0xff] }
 0x126   :  { %v669_v22 = vmul.f32 %v1507_v28, %v502_v25  ;;  %v414_v42 = vadd.f32 1.0, %v398_v2  ;;  %v452_v57 = vsub.f32 %v274_v9, %v1469_v4  ;;  %vm516_vm10 = vcmp.gt.f32.partialorder %v398_v2, 0.0  ;;  %968 = vst [vmem:[#allocation4 + $0x70] sm:$0xff] %v936_v54 }
 0x127   :  { %v864_v30 = vmul.f32 %v1447_v46, %v661_v23  ;;  %v476_v3 = vmax.f32 %v460_v44, 0.0  ;;  %v926_v50 = vmul.f32 %v1472_v5, %v675_v26  ;;  %v532_v46 = vsel %vm516_vm10, 1.0, %v1153_v24 }
 0x128   :  { %v872_v62 = vmul.f32 %v1457_v1, %v669_v22  ;;  %v430_v49 = vmax.f32 %v414_v42, 0.0  ;;  %v468_v36 = vadd.f32 1.0, %v452_v57  ;;  %v393_v28 = vsub.f32 %v1059_v19, %v1354_v55  ;;  %v1654_v22 = vld [vmem:[#allocation14_spill] sm:$0xff] }
 0x129   :  { %v492_v38 = vadd.f32 %v476_v3, %v422_v51  ;;  %896 = vst [vmem:[#allocation2 + $0x30] sm:$0xff] %v864_v30  ;;  %v683_v43 = vmul.f32 %v1400_v27, %v532_v46  ;;  %v447_v60 = vsub.f32 %v1059_v19, %v1469_v4  ;;  %958 = vst [vmem:[#allocation4 + $0x20] sm:$0xff] %v926_v50  ;;  %v1655_v3 = vld [vmem:[#allocation15_spill] sm:$0xff] }
 0x12a   :  { %v484_v29 = vmax.f32 %v468_v36, 0.0  ;;  %v409_v1 = vadd.f32 1.0, %v393_v28  ;;  %vm511_vm11 = vcmp.gt.f32.partialorder %v393_v28, 0.0  ;;  %904 = vst [vmem:[#allocation2 + $0x70] sm:$0xff] %v872_v62  ;;  %v401_v55 = vsub.f32 %v1067_v16, %v1370_v63  ;;  %v277_v63 = vpop.f32.mrf.mxu1 }
 0x12b   :  { %v659_v11 = vmul.f32 %v1454_v48, %v492_v38  ;;  %v934_v37 = vmul.f32 %v1475_v6, %v683_v43  ;;  %v463_v31 = vadd.f32 1.0, %v447_v60  ;;  %v527_v21 = vsel %vm511_vm11, 1.0, %v1153_v24  ;;  %v1657_v60 = vld [vmem:[#allocation10_spill] sm:$0xff] }
 0x12c   :  { %v500_v33 = vadd.f32 %v484_v29, %v430_v49  ;;  %v425_v47 = vmax.f32 %v409_v1, 0.0  ;;  %v678_v48 = vmul.f32 %v1400_v27, %v527_v21  ;;  %v417_v39 = vadd.f32 1.0, %v401_v55 }
 0x12d   :  { %v862_v34 = vmul.f32 %v1472_v5, %v659_v11  ;;  %v479_v56 = vmax.f32 %v463_v31, 0.0  ;;  %v455_v12 = vsub.f32 %v1067_v16, %v1469_v4  ;;  %vm519_vm13 = vcmp.gt.f32.partialorder %v401_v55, 0.0  ;;  %966 = vst [vmem:[#allocation4 + $0x60] sm:$0xff] %v934_v37 }
 0x12e   :  { %v667_v20 = vmul.f32 %v1492_v18, %v500_v33  ;;  %v929_v0 = vmul.f32 %v1484_v15, %v678_v48  ;;  %v433_v7 = vmax.f32 %v417_v39, 0.0  ;;  %v535_v5 = vsel %vm519_vm13, 1.0, %v1153_v24 }
 0x12f   :  { %v495_v45 = vadd.f32 %v479_v56, %v425_v47  ;;  %v471_v13 = vadd.f32 1.0, %v455_v12  ;;  %894 = vst [vmem:[#allocation2 + $0x20] sm:$0xff] %v862_v34  ;;  %v686_v61 = vmul.f32 %v1400_v27, %v535_v5  ;;  %v391_v9 = vsub.f32 %v245_v59, %v1650_v40 }
 0x130   :  { %v870_v52 = vmul.f32 %v1475_v6, %v667_v20  ;;  %v445_v32 = vsub.f32 %v245_v59, %v1469_v4  ;;  %v399_v10 = vsub.f32 %v277_v63, %v1652_v58  ;;  %961 = vst [vmem:[#allocation4 + $0x38] sm:$0xff] %v929_v0  ;;  %v453_v19 = vsub.f32 %v277_v63, %v1469_v4  ;;  %v1656_v4 = vld [vmem:[#allocation11_spill] sm:$0xff] }
 0x131   :  { %v662_v8 = vmul.f32 %v1651_v17, %v495_v45  ;;  %v487_v18 = vmax.f32 %v471_v13, 0.0  ;;  %v937_v23 = vmul.f32 %v1653_v41, %v686_v61  ;;  %v407_v25 = vadd.f32 1.0, %v391_v9 }
 0x132   :  { %vm509_vm14 = vcmp.gt.f32.partialorder %v391_v9, 0.0  ;;  %v461_v6 = vadd.f32 1.0, %v445_v32  ;;  %902 = vst [vmem:[#allocation2 + $0x60] sm:$0xff] %v870_v52  ;;  %v415_v30 = vadd.f32 1.0, %v399_v10  ;;  %vm517_vm15 = vcmp.gt.f32.partialorder %v399_v10, 0.0 }
 0x133   :  { %v865_v2 = vmul.f32 %v1484_v15, %v662_v8  ;;  %v503_v54 = vadd.f32 %v487_v18, %v433_v7  ;;  %v525_v51 = vsel %vm509_vm14, 1.0, %v1153_v24  ;;  %v423_v44 = vmax.f32 %v407_v25, 0.0  ;;  %969 = vst [vmem:[#allocation4 + $0x78] sm:$0xff] %v937_v23 }
 0x134   :  { %v676_v53 = vmul.f32 %v1400_v27, %v525_v51  ;;  %v477_v42 = vmax.f32 %v461_v6, 0.0  ;;  %v431_v62 = vmax.f32 %v415_v30, 0.0  ;;  %v839_v15 = vsel %vm823_vm12, 1.0, %v1153_v24 }
 0x135   :  { %v670_v26 = vmul.f32 %v1654_v22, %v503_v54  ;;  %897 = vst [vmem:[#allocation2 + $0x38] sm:$0xff] %v865_v2  ;;  %v469_v38 = vadd.f32 1.0, %v453_v19  ;;  %v533_v36 = vsel %vm517_vm15, 1.0, %v1153_v24  ;;  %v652_v14 = vmul.f32 %v1400_v27, %v1657_v60 }
 0x136   :  { %v927_v57 = vmul.f32 %v1655_v3, %v676_v53  ;;  %v493_v49 = vadd.f32 %v477_v42, %v423_v44  ;;  %v684_v46 = vmul.f32 %v1400_v27, %v533_v36 }
 0x137   :  { %v873_v50 = vmul.f32 %v1653_v41, %v670_v26  ;;  %v485_v16 = vmax.f32 %v469_v38, 0.0 }
 0x138   :  { %v660_v28 = vmul.f32 %v1656_v4, %v493_v49  ;;  %959 = vst [vmem:[#allocation4 + $0x28] sm:$0xff] %v927_v57  ;;  %v935_v43 = vmul.f32 %v839_v15, %v684_v46 }
 0x139   :  { %905 = vst [vmem:[#allocation2 + $0x78] sm:$0xff] %v873_v50  ;;  %v501_v11 = vadd.f32 %v485_v16, %v431_v62 }
 0x13a   :  { %v863_v35 = vmul.f32 %v1655_v3, %v660_v28  ;;  %967 = vst [vmem:[#allocation4 + $0x68] sm:$0xff] %v935_v43 }
 0x13b   :  { %v668_v29 = vmul.f32 %v652_v14, %v501_v11 }
 0x13c   :  { %895 = vst [vmem:[#allocation2 + $0x28] sm:$0xff] %v863_v35 }
 0x13d   :  { %v871_v24 = vmul.f32 %v839_v15, %v668_v29 }
 0x13e   :  { %1119 = shalt.err (!%p1116_p4)
}
 0x13f   :  { %s1156_s29 = smov 128   ;;  %s1157_s2 = smov 8   ;;  %903 = vst [vmem:[#allocation2 + $0x68] sm:$0xff] %v871_v24 }
 0x140   :  { %993 = dma.vmem_to_hbm [thread:$0]  %s988_s26, 2048, %s1639_s7, [#allocation5], %s1156_s29, %s1156_s29, %s1157_s2  }
 0x141   :  { %s1128_s9 = scalar_lea.vmem %s976_s1, 2048  ;;  %p1133_p6 = scmp.lt.s32.totalorder %s976_s1, %s976_s1 }
 0x142   :  { %p1129_p5 = scmp.ne.s32.totalorder %s976_s1, %s1128_s9  ;;  %p1134_p7 = scmp.lt.s32.totalorder %s1128_s9, %s1128_s9 }
 0x144   :  { %p1135_p8 = por %p1134_p7, %p1133_p6 }
 0x146   :  { %p1136_p9 = pnand %p1135_p8, %p1129_p5 }
 0x148   :  { %1139 = shalt.err (!%p1136_p9)
}
 0x149   :  { %981 = dma.vmem_to_hbm [thread:$0]  %s976_s1, 2048, %s1638_s6, [#allocation3], %s1156_s29, %s1156_s29, %s1157_s2  }
 0x14a   :  { %1148 = dma.done.wait [#allocation3], 2048  }
 0x14b   :  { %1149 = vsyncadd [#allocation3], 4294965248 }
 0x14c   :  { %1150 = dma.done.wait [#allocation5], 2048  }
 0x14d   :  { %1151 = vsyncadd [#allocation5], 4294965248 }
 0x14e   :  { %1000 = vsyncpa [#allocation3], 1 }
 0x14f   :  { %1001 = vsyncpa [#allocation5], 1 }

</bundles_post_ra>
